<compile_context>
chip_gen: v6e
topology: v6e:2x2x1
jax: 0.10.0
libtpu: 0.0.40
codegen_flags: <defaults>
</compile_context>

<pallas_src>
import numpy as np
import jax
import jax.numpy as jnp
from jax import lax
from jax.experimental import pallas as pl
from jax.experimental.pallas import tpu as pltpu

_VMEM_LIMIT_BYTES = 32 * 1024 * 1024  # safe scoped-VMEM cap on v5e/v6e/v7x
# TODO(synk): for very large anchor counts (V*D tiles approaching the VMEM cap,
# mainly v7x with 64 MiB physical) add a V-tiled variant with a running
# (m0, m1) top-2 merge carried in VMEM scratch.


# ----------------------------------------------------------------------------
# Eval path:  getPrediction
#   sim_map = einsum('bkd, byd -> byk', vis, lan)
#   predictions[b, y, k] = (k == argmax_k sim_map[b, y, :])   (bool one-hot)
# Kernel emits only the argmax index; the one-hot expansion is done in XLA.
# ----------------------------------------------------------------------------
def _prediction_kernel(lan_ref, visT_ref, idx_ref):
    # lan_ref: (1, Y, D), visT_ref: (1, D, K), idx_ref: (1, Y, 1)
    lan = lan_ref[0]                                    # (Y, D)
    visT = visT_ref[0]                                  # (D, K)
    sim = jnp.dot(lan, visT, preferred_element_type=jnp.float32)   # (Y, K)
    K = sim.shape[1]
    maxval = jnp.max(sim, axis=-1, keepdims=True)                  # (Y, 1)
    k_iota = lax.broadcasted_iota(jnp.int32, sim.shape, 1)         # (Y, K)
    # first occurrence of the max -> matches torch .max() index semantics
    first_idx = jnp.min(jnp.where(sim == maxval, k_iota, K),
                        axis=-1, keepdims=True)                    # (Y, 1)
    idx_ref[0] = first_idx


def get_prediction(vis_emb, lan_emb):
    B, K, D = vis_emb.shape
    _, Y, _ = lan_emb.shape
    # One-time XLA transpose so the in-kernel contraction is lane(LHS) x sublane(RHS).
    visT = jnp.swapaxes(vis_emb, 1, 2)                  # (B, D, K)
    idx = pl.pallas_call(
        _prediction_kernel,
        out_shape=jax.ShapeDtypeStruct((B, Y, 1), jnp.int32),
        grid_spec=pltpu.PrefetchScalarGridSpec(
            num_scalar_prefetch=0,
            grid=(B,),
            in_specs=[
                pl.BlockSpec((1, Y, D), lambda b: (b, 0, 0)),
                pl.BlockSpec((1, D, K), lambda b: (b, 0, 0)),
            ],
            out_specs=pl.BlockSpec((1, Y, 1), lambda b: (b, 0, 0)),
        ),
        compiler_params=pltpu.CompilerParams(
            dimension_semantics=("parallel",),
            vmem_limit_bytes=_VMEM_LIMIT_BYTES,
        ),
    )(lan_emb, visT)
    # Expand the index into the boolean one-hot outside the kernel (tiny).
    k_range = jnp.arange(K, dtype=jnp.int32)[None, None, :]        # (1, 1, K)
    return k_range == idx                                           # (B, Y, K) bool


# ----------------------------------------------------------------------------
# Training path:  getContrast
#   sim_map = einsum('avd, bqd -> baqv', vis, lan)   (q == 1)
#   top-2 over v  ->  max_sim_0[b,a], max_sim_1[b,a]
# One grid step per visual batch element `a`; all language queries resident.
# Off-diagonal selection / concat / CrossEntropy are tiny (B x 2B-1) and are
# done as plain-JAX glue outside the kernel.
# ----------------------------------------------------------------------------
def _contrast_kernel(vis_ref, lanT_ref, m0_ref, m1_ref):
    # vis_ref: (1, V, D)   anchors of visual batch element a  (streamed)
    # lanT_ref: (D, B)     all language queries, pre-transposed (resident)
    # m0_ref / m1_ref: (1, 1, B)  lane-dense per-step output rows
    vis = vis_ref[0]                                    # (V, D)
    lanT = lanT_ref[...]                                # (D, B)
    sim = jnp.dot(vis, lanT, preferred_element_type=jnp.float32)   # (V, B)
    V = sim.shape[0]
    m0 = jnp.max(sim, axis=0, keepdims=True)                        # (1, B)
    v_iota = lax.broadcasted_iota(jnp.int32, sim.shape, 0)          # (V, B)
    # mask only the FIRST occurrence of the max so duplicate maxima still
    # yield m1 == m0 (matches torch.topk(k=2))
    first_idx = jnp.min(jnp.where(sim == m0, v_iota, V),
                        axis=0, keepdims=True)                      # (1, B)
    masked = jnp.where(v_iota == first_idx, -jnp.inf, sim)
    m1 = jnp.max(masked, axis=0, keepdims=True)                     # (1, B)
    m0_ref[0] = m0
    m1_ref[0] = m1


def get_contrast(vis_emb, lan_emb):
    A, V, D = vis_emb.shape
    B, Q, _ = lan_emb.shape
    assert Q == 1, "getContrast requires a single language query (squeeze(2))"
    assert V >= 2, "torch.topk(k=2) requires at least 2 visual anchors"
    assert A == B, "contrastive off-diagonal selection requires matching batch sizes"

    # One-time XLA transpose; stays resident in VMEM across all grid steps.
    lanT = jnp.transpose(lan_emb[:, 0, :])              # (D, B)

    m0, m1 = pl.pallas_call(
        _contrast_kernel,
        out_shape=(jax.ShapeDtypeStruct((A, 1, B), jnp.float32),
                   jax.ShapeDtypeStruct((A, 1, B), jnp.float32)),
        grid_spec=pltpu.PrefetchScalarGridSpec(
            num_scalar_prefetch=0,
            grid=(A,),
            in_specs=[
                pl.BlockSpec((1, V, D), lambda a: (a, 0, 0)),   # vis streamed once
                pl.BlockSpec((D, B), lambda a: (0, 0)),         # lanT resident
            ],
            out_specs=(pl.BlockSpec((1, 1, B), lambda a: (a, 0, 0)),
                       pl.BlockSpec((1, 1, B), lambda a: (a, 0, 0))),
        ),
        compiler_params=pltpu.CompilerParams(
            dimension_semantics=("parallel",),
            vmem_limit_bytes=_VMEM_LIMIT_BYTES,
        ),
    )(vis_emb, lanT)

    max_sim_0 = jnp.transpose(m0.reshape(A, B))          # (B, A)
    max_sim_1 = jnp.transpose(m1.reshape(A, B))          # (B, A)

    # masked_select(~eye) row-major -> (B, B-1) off-diagonal, increasing column order
    off_idx = np.array([[j for j in range(B) if j != i] for i in range(B)],
                       dtype=np.int32).reshape(B, B - 1)
    max_sim_1_off = jnp.take_along_axis(max_sim_1, jnp.asarray(off_idx), axis=1)

    new_logits = jnp.concatenate([max_sim_0, max_sim_1_off], axis=1)  # (B, 2B-1)
    target = jnp.arange(B)
    # nn.CrossEntropyLoss(reduction='mean')
    lse = jax.nn.logsumexp(new_logits, axis=1)
    picked = new_logits[target, target]
    return jnp.mean(lse - picked)


def weak_rec_head(vis_fs, lan_fs, training=True):
    """Forward pass of WeakREChead (the module has no learnable parameters)."""
    if training:
        return get_contrast(vis_fs, lan_fs)
    return get_prediction(vis_fs, lan_fs)


# ----------------------------------------------------------------------------
# Pure-JAX reference for a sanity check
# ----------------------------------------------------------------------------
def _ref_prediction(vis, lan):
    sim = jnp.einsum('bkd,byd->byk', vis, lan)
    idx = jnp.argmax(sim, axis=2, keepdims=True)
    k_iota = jnp.arange(sim.shape[2])[None, None, :]
    return k_iota == idx


def _ref_contrast(vis, lan):
    sim = jnp.einsum('avd,bqd->baqv', vis, lan)          # (B, A, 1, V)
    top2 = -jnp.sort(-sim, axis=-1)[..., :2]
    top2 = top2[:, :, 0, :]                              # (B, A, 2)
    m0, m1 = top2[..., 0], top2[..., 1]
    B = sim.shape[0]
    off_idx = np.array([[j for j in range(B) if j != i] for i in range(B)],
                       dtype=np.int32).reshape(B, B - 1)
    m1_off = jnp.take_along_axis(m1, jnp.asarray(off_idx), axis=1)
    logits = jnp.concatenate([m0, m1_off], axis=1)
    lse = jax.nn.logsumexp(logits, axis=1)
    picked = logits[jnp.arange(B), jnp.arange(B)]
    return jnp.mean(lse - picked)


if __name__ == "__main__":
    key = jax.random.PRNGKey(0)
    k1, k2 = jax.random.split(key)

    B, K, D, Q = 2, 16, 32, 1
    vis_fs = jax.random.normal(k1, (B, K, D), dtype=jnp.float32)   # visual anchor embeddings
    lan_fs = jax.random.normal(k2, (B, Q, D), dtype=jnp.float32)   # language query embedding

    # training path -> contrastive loss (scalar)
    loss = weak_rec_head(vis_fs, lan_fs, training=True)
    loss = jax.block_until_ready(loss)

    # eval path -> boolean one-hot predictions (B, Q, K)
    preds = weak_rec_head(vis_fs, lan_fs, training=False)
    preds = jax.block_until_ready(preds)

    # sanity checks against plain-JAX reference
    ref_loss = _ref_contrast(vis_fs, lan_fs)
    ref_preds = _ref_prediction(vis_fs, lan_fs)
    assert np.allclose(np.asarray(loss), np.asarray(ref_loss), atol=1e-5, rtol=1e-5)
    assert np.array_equal(np.asarray(preds), np.asarray(ref_preds))

    print("KERNEL_OK")
</pallas_src>

<mosaic_0001>
module attributes {stable_mosaic.version = 11 : i64} {
  func.func @_contrast_kernel(%arg0: i32, %arg1: memref<1x16x32xf32, #tpu.memory_space<vmem>>, %arg2: memref<32x2xf32, #tpu.memory_space<vmem>>, %arg3: memref<1x1x2xf32, #tpu.memory_space<vmem>>, %arg4: memref<1x1x2xf32, #tpu.memory_space<vmem>>) attributes {dimension_semantics = [#tpu.dimension_semantics<parallel>], iteration_bounds = array<i64: 2>, scalar_prefetch = 0 : i64, scratch_operands = 0 : i64, tpu.core_type = #tpu.core_type<tc>, window_params = [{transform_indices = @transform_0, window_bounds = array<i64: 1, 16, 32>}, {pipeline_mode = #tpu.pipeline_mode<synchronous>, transform_indices = @transform_1, window_bounds = array<i64: 32, 2>}, {transform_indices = @transform_2, window_bounds = array<i64: 1, 1, 2>}, {transform_indices = @transform_3, window_bounds = array<i64: 1, 1, 2>}]} {
    %c0 = arith.constant 0 : index
    %c0_0 = arith.constant 0 : index
    %c0_1 = arith.constant 0 : index
    %0 = vector.load %arg1[%c0, %c0_0, %c0_1] : memref<1x16x32xf32, #tpu.memory_space<vmem>>, vector<1x16x32xf32>
    %1 = vector.shape_cast %0 : vector<1x16x32xf32> to vector<16x32xf32>
    %c0_2 = arith.constant 0 : index
    %c0_3 = arith.constant 0 : index
    %2 = vector.load %arg2[%c0_2, %c0_3] : memref<32x2xf32, #tpu.memory_space<vmem>>, vector<32x2xf32>
    %cst = arith.constant dense<0.000000e+00> : vector<16x2xf32>
    %3 = tpu.matmul %1, %2, %cst {dimension_numbers = #tpu.dot_dimension_numbers<[1], [0], [0], [1], [0, 0, 1, 1], [], []>} : vector<16x32xf32>, vector<32x2xf32>, vector<16x2xf32> -> vector<16x2xf32>
    %cst_4 = arith.constant dense<0xFF800000> : vector<2xf32>
    %4 = vector.multi_reduction <maximumf>, %3, %cst_4 [0] : vector<16x2xf32> to vector<2xf32>
    %5 = vector.shape_cast %4 : vector<2xf32> to vector<1x2xf32>
    %6 = tpu.iota {dimensions = array<i32: 0>} : vector<16x2xi32>
    %7 = vector.broadcast %5 : vector<1x2xf32> to vector<16x2xf32>
    %8 = arith.cmpf oeq, %3, %7 : vector<16x2xf32>
    %c16_i32 = arith.constant 16 : i32
    %9 = vector.broadcast %c16_i32 : i32 to vector<16x2xi32>
    %10 = arith.select %8, %6, %9 : vector<16x2xi1>, vector<16x2xi32>
    %cst_5 = arith.constant dense<2147483647> : vector<2xi32>
    %11 = vector.multi_reduction <minsi>, %10, %cst_5 [0] : vector<16x2xi32> to vector<2xi32>
    %12 = vector.shape_cast %11 : vector<2xi32> to vector<1x2xi32>
    %13 = vector.broadcast %12 : vector<1x2xi32> to vector<16x2xi32>
    %14 = arith.cmpi eq, %6, %13 : vector<16x2xi32>
    %cst_6 = arith.constant 0xFF800000 : f32
    %15 = vector.broadcast %cst_6 : f32 to vector<16x2xf32>
    %16 = arith.select %14, %15, %3 : vector<16x2xi1>, vector<16x2xf32>
    %cst_7 = arith.constant dense<0xFF800000> : vector<2xf32>
    %17 = vector.multi_reduction <maximumf>, %16, %cst_7 [0] : vector<16x2xf32> to vector<2xf32>
    %18 = vector.shape_cast %17 : vector<2xf32> to vector<1x2xf32>
    %c0_8 = arith.constant 0 : index
    %c0_9 = arith.constant 0 : index
    %c0_10 = arith.constant 0 : index
    %19 = vector.load %arg3[%c0_8, %c0_9, %c0_10] : memref<1x1x2xf32, #tpu.memory_space<vmem>>, vector<1x1x2xf32>
    %20 = vector.shape_cast %19 : vector<1x1x2xf32> to vector<1x2xf32>
    %21 = vector.shape_cast %5 : vector<1x2xf32> to vector<1x1x2xf32>
    tpu.vector_store %arg3[%c0_8, %c0_9, %c0_10], %21 {strides = array<i32>} : memref<1x1x2xf32, #tpu.memory_space<vmem>>, vector<1x1x2xf32>,
    %c0_11 = arith.constant 0 : index
    %c0_12 = arith.constant 0 : index
    %c0_13 = arith.constant 0 : index
    %22 = vector.load %arg4[%c0_11, %c0_12, %c0_13] : memref<1x1x2xf32, #tpu.memory_space<vmem>>, vector<1x1x2xf32>
    %23 = vector.shape_cast %22 : vector<1x1x2xf32> to vector<1x2xf32>
    %24 = vector.shape_cast %18 : vector<1x2xf32> to vector<1x1x2xf32>
    tpu.vector_store %arg4[%c0_11, %c0_12, %c0_13], %24 {strides = array<i32>} : memref<1x1x2xf32, #tpu.memory_space<vmem>>, vector<1x1x2xf32>,
    return
  }
  func.func @transform_0(%arg0: i32) -> (i32, i32, i32) {
    %c0_i32 = arith.constant 0 : i32
    %c0_i32_0 = arith.constant 0 : i32
    %c0_i32_1 = arith.constant 0 : i32
    return %arg0, %c0_i32, %c0_i32_0 : i32, i32, i32
  }
  func.func @transform_1(%arg0: i32) -> (i32, i32) {
    %c0_i32 = arith.constant 0 : i32
    %c0_i32_0 = arith.constant 0 : i32
    %c0_i32_1 = arith.constant 0 : i32
    return %c0_i32, %c0_i32_0 : i32, i32
  }
  func.func @transform_2(%arg0: i32) -> (i32, i32, i32) {
    %c0_i32 = arith.constant 0 : i32
    %c0_i32_0 = arith.constant 0 : i32
    %c0_i32_1 = arith.constant 0 : i32
    return %arg0, %c0_i32, %c0_i32_0 : i32, i32, i32
  }
  func.func @transform_3(%arg0: i32) -> (i32, i32, i32) {
    %c0_i32 = arith.constant 0 : i32
    %c0_i32_0 = arith.constant 0 : i32
    %c0_i32_1 = arith.constant 0 : i32
    return %arg0, %c0_i32, %c0_i32_0 : i32, i32, i32
  }
}

</mosaic_0001>

<bundles_post_ra>
// kernel: tpu_custom_call.1
= control target key start
LH: loop header
LB: loop body
LE: loop exit
PB: predicated region body
PF: predicated region fallthrough
CT: control target
= control target key end

     0   :  { %9 = vsyncpa [#allocation3], 0  ;;  %s767_s0 = inlined_call_operand.vmem [shape: f32[2,16,32], index: 0, kind: input, shape index: {}]   ;;  %s768_s1 = inlined_call_operand.vmem [shape: f32[32,2], index: 1, kind: input, shape index: {}]   ;;  %s769_s2 = inlined_call_operand.hbm [shape: f32[2,1,2], index: 2, kind: output, shape index: {0}]   ;;  %s770_s3 = inlined_call_operand.hbm [shape: f32[2,1,2], index: 3, kind: output, shape index: {1}]  }
   0x1   :  { %11 = vsyncpa [#allocation3 + $0x1], 0 }
   0x2   :  { %12 = vsyncpa [#allocation5], 0 }
   0x3   :  { %14 = vsyncpa [#allocation5 + $0x1], 0  ;;  %s613_s12 = smov 0   ;;  %s615_s13 = smov 0  }
   0x4   :  { %s617_s14 = smov 0   ;;  %s619_s15 = smov 0  }
   0x5 LB: > { %s634_s16 = sadd.s32 4294967295, %s589_s15   ;;  %s425_s17 = sadd.s32 4294967294, %s589_s15   ;;  %s589_s15 = sphi %s619_s15, %s776_s15   ;;  %s585_s14 = sphi %s617_s14, %s775_s14   ;;  %s581_s13 = sphi %s615_s13, %s774_s13   ;;  %s577_s12 = sphi %s613_s12, %s773_s12  }
   0x6   : > { %s638_s18 = sadd.s32 1, %s589_s15   ;;  %s74_s19 = sadd.s32 1, %s585_s14 }
   0x7   : > { %s71_s20 = ssub.s32 %s589_s15, %s638_s18  ;;  %p84_p0 = scmp.ne.s32.totalorder %s585_s14, %s581_s13 }
   0x8   : > { %p72_p1 = scmp.eq.s32.totalorder %s71_s20, 0  ;;  %p85_p2 = scmp.eq.s32.totalorder %s634_s16, 1 }
   0x9   : > { %p90_p3 = scmp.ne.s32.totalorder %s581_s13, %s577_s12  ;;  %p91_p4 = scmp.eq.s32.totalorder %s425_s17, 1 }
   0xa   : > { %s649_s21 = scalar_select %p72_p1, %s585_s14, %s74_s19  }
   0xb   : > { %p651_p5 = por %p85_p2, %p84_p0  ;;  %p655_p6 = por %p91_p4, %p90_p3 }
   0xc   : > { %p428_p7 = scmp.ge.s32.totalorder %s589_s15, 1  ;;  %p146_p8 = scmp.lt.s32.totalorder %s589_s15, 3 }
   0xe   : > { %p147_p9 = pnand %p428_p7, %p146_p8 }
   0xf   : > { %p173_p10 = scmp.lt.s32.totalorder (!%p147_p9), %s634_s16, 1  ;;  %s687_s10 = sand.u32 (!%p147_p9), 1, %s581_s13  }
  0x10   : > { %150 = sbr.rel (%p147_p9) target bundleno = 298 (0x12a), region = 28  ;;  %s433_s11 = sshll.u32 (!%p147_p9), %s634_s16, 4 }
  0x11   : > { %s166_s17 = scalar_lea.vmem (!%p147_p9), [#allocation2], %s687_s10  ;;  %s696_s25 = scalar_lea.hbm (!%p147_p9), %s769_s2, %s433_s11 }
  0x12   : > { %s329_s19 = sshll.u32 (!%p147_p9), %s166_s17, 4  ;;  %s313_s26 = scalar_lea.sflag (!%p147_p9), [#allocation3], %s687_s10  ;;  %s698_s19 = int_to_ptr.vmem [resolvable:$true] %s329_s19 }
  0x13   : > { %s499_s27 = scalar_lea.vmem (!%p147_p9), %s698_s19, 16  ;;  %s591_s28 = smov (!%p147_p9), [#allocation2]  }
  0x14   : > { %p500_p11 = scmp.ne.s32.totalorder (!%p147_p9), %s698_s19, %s499_s27  ;;  %s503_s29 = sshll.u32 (!%p147_p9), %s591_s28, 4  ;;  %s504_s29 = int_to_ptr.vmem [resolvable:$false] %s503_s29 }
  0x15   : > { %v183_v0 = vld [vmem:[%s768_s1 + $0x18] sm:$0xff]  ;;  %v182_v1 = vld [vmem:[%s768_s1 + $0x10] sm:$0xff]  ;;  %v181_v2 = vld [vmem:[%s768_s1 + $0x8] sm:$0xff]  ;;  %s174_s30 = scalar_select %p173_p10, %s634_s16, 1  ;;  %vm184_vm0 = vcmask 261120   ;;  %vm266_vm1 = vcmask 15360   ;;  %v276_v12 = vlaneseq }
  0x16   : > { %444 = vmatprep.subr.mxu0 %v183_v0  ;;  %v180_v3 = vld [vmem:[%s768_s1] sm:$0xff]  ;;  %vm309_vm2 = vcmask 8192   ;;  %p501_p12 = pnand %p500_p11, %p651_p5  ;;  %p506_p0 = scmp.lt.s32.totalorder %s698_s19, %s504_s29 }
  0x17   : > { %445 = vmatpush3.msra.mxu0 %v183_v0  ;;  %s437_s6 = sshll.u32 %s174_s30, 4  ;;  %v277_v15 = vshrl.u32 %v276_v12, 7  ;;  %s505_s30 = scalar_lea.vmem %s504_s29, 32 }
  0x18   : > { %446 = vmatprep.subr.mxu0 %v182_v1  ;;  %s177_s9 = scalar_lea.vmem %s767_s0, %s437_s6  ;;  %p502_p13 = pneg %p501_p12 }
  0x19   : > { %447 = vmatpush3.msra.mxu0 %v182_v1  ;;  %v178_v4 = vld [vmem:[%s177_s9] sm:$0xff]  ;;  %v179_v5 = vld [vmem:[%s177_s9 + $0x8] sm:$0xff]  ;;  %v278_v18 = vadd.s32 8, %v277_v15  ;;  %p507_p1 = scmp.lt.s32.totalorder %s505_s30, %s499_s27 }
  0x1a   : > { %448 = vmatprep.subr.mxu0 %v181_v2  ;;  %452 = vmatprep.mubr.msk.f32.mxu0 %vm184_vm0, %v178_v4 }
  0x1b   : > { %449 = vmatpush3.msra.mxu0 %v181_v2  ;;  %p508_p2 = por %p507_p1, %p506_p0 }
  0x1c   : > { %450 = vmatprep.subr.mxu0 %v180_v3 }
  0x1d   : > { %451 = vmatpush3.msra.mxu0 %v180_v3  ;;  %p509_p3 = pnand %p508_p2, %p502_p13 }
  0x1e   : > { %453 = vmatmul.mubr.msk.f32.vlgmr.msra.gmra.mxu0 %vm184_vm0, %v179_v5 }
  0xde   : > { %v678_v6 = vpop.f32.mrf.mxu0 }
  0xdf   : > { %v268_v8 = vsel %vm266_vm1, %v678_v6, -inf }
  0xe0   : > { %v680_v7 = vpop.f32.mrf.mxu0 }
  0xe1   : > { %v267_v9 = vsel %vm266_vm1, %v680_v7, -inf }
  0xe2   : > { %v269_v10 = vmax.f32 %v267_v9, %v268_v8 }
  0xe4   : > { %v270_v11 = vrot.slane %v269_v10, 4 }
  0xe6   : > { %v271_v13 = vmax.f32 %v269_v10, %v270_v11 }
  0xe8   : > { %v272_v14 = vrot.slane %v271_v13, 2 }
  0xea   : > { %v273_v16 = vmax.f32 %v271_v13, %v272_v14 }
  0xec   : > { %v274_v17 = vrot.slane %v273_v16, 1 }
  0xee   : > { %v275_v19 = vmax.f32 %v273_v16, %v274_v17 }
  0xf0   : > { %vm279_vm3 = vcmp.eq.f32.partialorder %v680_v7, %v275_v19  ;;  %vm280_vm4 = vcmp.eq.f32.partialorder %v678_v6, %v275_v19  ;;  %310 = vst.msk [vmem:[%s166_s17] sm:$0x1] %vm309_vm2, %v275_v19 }
  0xf1   : > { %v281_v20 = vsel %vm279_vm3, %v277_v15, 16  ;;  %v282_v21 = vsel %vm280_vm4, %v278_v18, 16 }
  0xf2   : > { %512 = shalt.err (!%p509_p3)
}
  0xf3   : > { %s513_s4 = scalar_lea.hbm %s696_s25, 16  ;;  %s517_s7 = scalar_lea.hbm %s769_s2, 32 }
  0xf4   : > { %p514_p4 = scmp.ne.s32.totalorder %s696_s25, %s513_s4  ;;  %p518_p9 = scmp.lt.s32.totalorder %s696_s25, %s769_s2 }
  0xf5   : > { %p519_p10 = scmp.lt.s32.totalorder %s517_s7, %s513_s4 }
  0xf6   : > { %p515_p7 = pnand %p514_p4, %p651_p5 }
  0xf7   : > { %p520_p11 = por %p519_p10, %p518_p9 }
  0xf8   : > { %p516_p8 = pneg %p515_p7 }
  0xfa   : > { %p521_p12 = pnand %p520_p11, %p516_p8 }
  0xfc   : > { %524 = shalt.err (!%p521_p12)
}
  0xfd   : > { %455 = dma.vmem_to_hbm [thread:$0]  (%p651_p5), %s698_s19, 16, %s696_s25, %s313_s26   ;;  %v283_v22 = vsel %vm266_vm1, %v281_v20, 2147483647  ;;  %v284_v23 = vsel %vm266_vm1, %v282_v21, 2147483647 }
  0xfe   : > { %vm285_vm5 = vcmp.lt.s32.totalorder %v283_v22, %v284_v23  ;;  %s172_s17 = scalar_lea.vmem [#allocation4], %s687_s10  ;;  %s340_s25 = scalar_lea.hbm %s770_s3, %s433_s11 }
  0xff   : > { %v286_v24 = vsel %vm285_vm5, %v283_v22, %v284_v23  ;;  %s342_s19 = sshll.u32 %s172_s17, 4  ;;  %s317_s26 = scalar_lea.sflag [#allocation5], %s687_s10  ;;  %s343_s19 = int_to_ptr.vmem [resolvable:$true] %s342_s19 }
 0x100   : > { %v287_v25 = vrot.slane %v286_v24, 4  ;;  %s525_s27 = scalar_lea.vmem %s343_s19, 16  ;;  %s592_s28 = smov [#allocation4]  }
 0x101   : > { %p526_p13 = scmp.ne.s32.totalorder %s343_s19, %s525_s27  ;;  %s529_s29 = sshll.u32 %s592_s28, 4  ;;  %s530_s29 = int_to_ptr.vmem [resolvable:$false] %s529_s29 }
 0x102   : > { %vm288_vm6 = vcmp.lt.s32.totalorder %v286_v24, %v287_v25  ;;  %s531_s30 = scalar_lea.vmem %s530_s29, 32  ;;  %p532_p2 = scmp.lt.s32.totalorder %s343_s19, %s530_s29 }
 0x103   : > { %v289_v26 = vsel %vm288_vm6, %v286_v24, %v287_v25  ;;  %p527_p0 = pnand %p526_p13, %p651_p5  ;;  %p533_p3 = scmp.lt.s32.totalorder %s531_s30, %s525_s27 }
 0x104   : > { %v290_v27 = vrot.slane %v289_v26, 2 }
 0x105   : > { %p528_p1 = pneg %p527_p0  ;;  %p534_p4 = por %p533_p3, %p532_p2 }
 0x106   : > { %vm291_vm7 = vcmp.lt.s32.totalorder %v289_v26, %v290_v27 }
 0x107   : > { %v292_v28 = vsel %vm291_vm7, %v289_v26, %v290_v27  ;;  %p535_p7 = pnand %p534_p4, %p528_p1 }
 0x108   : > { %v293_v29 = vrot.slane %v292_v28, 1 }
 0x10a   : > { %vm294_vm8 = vcmp.lt.s32.totalorder %v292_v28, %v293_v29 }
 0x10b   : > { %v295_v30 = vsel %vm294_vm8, %v292_v28, %v293_v29 }
 0x10c   : > { %vm296_vm9 = vcmp.eq.s32.totalorder %v277_v15, %v295_v30  ;;  %vm297_vm10 = vcmp.eq.s32.totalorder %v278_v18, %v295_v30 }
 0x10d   : > { %v298_v31 = vsel %vm296_vm9, -inf, %v680_v7  ;;  %v299_v32 = vsel %vm297_vm10, -inf, %v678_v6 }
 0x10e   : > { %v300_v33 = vsel %vm266_vm1, %v298_v31, -inf  ;;  %v301_v34 = vsel %vm266_vm1, %v299_v32, -inf }
 0x10f   : > { %v302_v35 = vmax.f32 %v300_v33, %v301_v34 }
 0x111   : > { %v303_v36 = vrot.slane %v302_v35, 4 }
 0x113   : > { %v304_v37 = vmax.f32 %v302_v35, %v303_v36 }
 0x115   : > { %v305_v38 = vrot.slane %v304_v37, 2 }
 0x117   : > { %v306_v39 = vmax.f32 %v304_v37, %v305_v38 }
 0x119   : > { %v307_v40 = vrot.slane %v306_v39, 1 }
 0x11b   : > { %v308_v41 = vmax.f32 %v306_v39, %v307_v40 }
 0x11d   : > { %311 = vst.msk [vmem:[%s172_s17] sm:$0x1] %vm309_vm2, %v308_v41 }
 0x11e   : > { %538 = shalt.err (!%p535_p7)
}
 0x11f   : > { %s539_s16 = scalar_lea.hbm %s340_s25, 16  ;;  %s543_s4 = scalar_lea.hbm %s770_s3, 32 }
 0x120   : > { %p540_p8 = scmp.ne.s32.totalorder %s340_s25, %s539_s16  ;;  %p544_p11 = scmp.lt.s32.totalorder %s340_s25, %s770_s3 }
 0x121   : > { %p545_p12 = scmp.lt.s32.totalorder %s543_s4, %s539_s16 }
 0x122   : > { %p541_p9 = pnand %p540_p8, %p651_p5 }
 0x123   : > { %p546_p13 = por %p545_p12, %p544_p11 }
 0x124   : > { %p542_p10 = pneg %p541_p9 }
 0x126   : > { %p547_p0 = pnand %p546_p13, %p542_p10 }
 0x128   : > { %550 = shalt.err (!%p547_p0)
}
 0x129   : > { %456 = dma.vmem_to_hbm [thread:$0]  (%p651_p5), %s343_s19, 16, %s340_s25, %s317_s26  }
 0x12a PF: > { %p466_p1 = scmp.ge.s32.totalorder %s589_s15, 2  ;;  %s354_s7 = sand.u32 1, %s577_s12  }
 0x12b   : > { %s355_s8 = scalar_lea.sflag [#allocation3], %s354_s7 }
 0x12c   : > { %p460_p2 = pnand %p466_p1, %p655_p6 }
 0x12e   : > { %p461_p3 = pneg %p460_p2 }
 0x130   : > { %568 = dma.done.wait (%p461_p3), %s355_s8, 16  }
 0x131   : > { %570 = vsyncadd (%p461_p3), %s355_s8, 4294967280  ;;  %s363_s9 = scalar_lea.sflag [#allocation5], %s354_s7 }
 0x132   : > { %572 = dma.done.wait (%p461_p3), %s363_s9, 16  }
 0x133   : > { %574 = vsyncadd (%p461_p3), %s363_s9, 4294967280  ;;  %p17_p5 = scmp.ge.s32.totalorder %s638_s18, 4   ;;  %s773_s12 = smov %s581_s13 }
 0x134   : > { %s774_s13 = smov %s585_s14  ;;  %s775_s14 = smov %s649_s21 }
 0x135   : > { %s776_s15 = smov %s638_s18  ;;  %19 = sbr.rel (!%p17_p5) target bundleno = 5 (0x5), region = 80 }
 0x13a   :  { %367 = vsyncpa [#allocation3], 1 }
 0x13b   :  { %369 = vsyncpa [#allocation3 + $0x1], 1 }
 0x13c   :  { %370 = vsyncpa [#allocation5], 1 }
 0x13d   :  { %372 = vsyncpa [#allocation5 + $0x1], 1 }

</bundles_post_ra>
